<compile_context>
chip_gen: v7x
topology: tpu7x:2x2x1
jax: 0.10.0
libtpu: 0.0.40
codegen_flags: <defaults>
</compile_context>

<pallas_src>
import math

import jax
import jax.numpy as jnp
from jax.experimental import pallas as pl
from jax.experimental.pallas import tpu as pltpu

BN_EPS = 1e-5


# ----------------------------- Pallas kernel --------------------------------

def _conv_bn_kernel(p_ref, w_ref, s_ref, b_ref, o_ref):
    # p_ref: (TM, K)   im2col patch rows
    # w_ref: (K, Cout) flattened conv weight
    # s_ref/b_ref: (1, Cout) fused BN scale / shift (incl. conv bias)
    # o_ref: (TM, Cout)
    y = jnp.dot(p_ref[...], w_ref[...], preferred_element_type=jnp.float32)
    o_ref[...] = y * s_ref[...] + b_ref[...]


def conv_bn_matmul(patches, w_mat, scale, shift, *, tile_m=256):
    """Fused (im2col-matmul + BN scale/shift). patches: (M, K), w_mat: (K, Cout)."""
    M, K = patches.shape
    Cout = w_mat.shape[1]
    Mp = ((M + tile_m - 1) // tile_m) * tile_m
    if Mp != M:
        patches = jnp.pad(patches, ((0, Mp - M), (0, 0)))
    out = pl.pallas_call(
        _conv_bn_kernel,
        out_shape=jax.ShapeDtypeStruct((Mp, Cout), jnp.float32),
        grid_spec=pltpu.PrefetchScalarGridSpec(
            num_scalar_prefetch=0,
            grid=(Mp // tile_m,),
            in_specs=[
                pl.BlockSpec((tile_m, K), lambda i: (i, 0)),
                pl.BlockSpec((K, Cout), lambda i: (0, 0)),
                pl.BlockSpec((1, Cout), lambda i: (0, 0)),
                pl.BlockSpec((1, Cout), lambda i: (0, 0)),
            ],
            out_specs=pl.BlockSpec((tile_m, Cout), lambda i: (i, 0)),
        ),
        compiler_params=pltpu.CompilerParams(
            dimension_semantics=("parallel",)),
    )(patches, w_mat, scale, shift)
    return out[:M]


# ----------------------------- module wrapper --------------------------------

def make_params(key, in_channels, out_channels, kernel_size, stride):
    # conv_init: kaiming_normal_(mode='fan_out') -> std = sqrt(2 / (Cout*k*k)),
    # bias = 0.  bn_init(bn, 1): gamma = 1, beta = 0; running stats default.
    fan_out = out_channels * kernel_size * kernel_size
    std = math.sqrt(2.0 / fan_out)
    w = jax.random.normal(
        key, (out_channels, in_channels, kernel_size, kernel_size),
        jnp.float32) * std
    return {
        "w": w,
        "b": jnp.zeros((out_channels,), jnp.float32),
        "bn_gamma": jnp.ones((out_channels,), jnp.float32),
        "bn_beta": jnp.zeros((out_channels,), jnp.float32),
        "bn_mean": jnp.zeros((out_channels,), jnp.float32),
        "bn_var": jnp.ones((out_channels,), jnp.float32),
        "stride": stride,
    }


def residual_module_forward(x, params):
    """x: (N, Cin, H, W) -> (N, Cout, Ho, Wo), matching bn(conv(x))."""
    # TODO(synk): BatchNorm is evaluated in inference mode with its stored
    # running statistics; PyTorch's train-mode batch statistics are not used.
    w = params["w"]                      # (Cout, Cin, k, k)
    b = params["b"]
    k = w.shape[2]
    s = int(params["stride"])
    p = (k - 1) // 2
    N, Cin, H, W = x.shape
    Cout = w.shape[0]
    Ho = (H + 2 * p - k) // s + 1
    Wo = (W + 2 * p - k) // s + 1

    # channels-last + zero padding
    xl = jnp.transpose(x, (0, 2, 3, 1))                      # (N, H, W, Cin)
    xp = jnp.pad(xl, ((0, 0), (p, p), (p, p), (0, 0)))

    # im2col: tap-major, Cin-minor -> (N*Ho*Wo, k*k*Cin)
    taps = []
    for dy in range(k):
        for dx in range(k):
            taps.append(xp[:, dy:dy + s * (Ho - 1) + 1:s,
                           dx:dx + s * (Wo - 1) + 1:s, :])
    patches = jnp.concatenate(taps, axis=-1).reshape(N * Ho * Wo, k * k * Cin)

    # flattened weight with matching (tap, Cin) ordering -> (k*k*Cin, Cout)
    w_mat = jnp.transpose(w, (2, 3, 1, 0)).reshape(k * k * Cin, Cout)

    # fold BN + conv bias: out = (conv + b) * scale + shift
    scale = params["bn_gamma"] / jnp.sqrt(params["bn_var"] + BN_EPS)
    shift = params["bn_beta"] + (b - params["bn_mean"]) * scale

    out = conv_bn_matmul(
        patches, w_mat,
        scale.reshape(1, Cout).astype(jnp.float32),
        shift.reshape(1, Cout).astype(jnp.float32))
    return jnp.transpose(out.reshape(N, Ho, Wo, Cout), (0, 3, 1, 2))


# ----------------------------- pure-JAX reference ----------------------------

def reference_forward(x, params):
    w, b = params["w"], params["b"]
    k = w.shape[2]
    s = int(params["stride"])
    p = (k - 1) // 2
    y = jax.lax.conv_general_dilated(
        x, w, window_strides=(s, s), padding=[(p, p), (p, p)],
        dimension_numbers=("NCHW", "OIHW", "NCHW"),
        precision=jax.lax.Precision.HIGHEST)
    y = y + b.reshape(1, -1, 1, 1)
    scale = params["bn_gamma"] / jnp.sqrt(params["bn_var"] + BN_EPS)
    shift = params["bn_beta"] - params["bn_mean"] * scale
    return y * scale.reshape(1, -1, 1, 1) + shift.reshape(1, -1, 1, 1)


# ----------------------------------- main ------------------------------------

if __name__ == "__main__":
    key = jax.random.PRNGKey(0)
    kx, kw1, kw2 = jax.random.split(key, 3)

    # small shapes consistent with the module: batch=2, Cin=4, 16x16 spatial
    N, Cin, H, W = 2, 4, 16, 16
    x = jax.random.normal(kx, (N, Cin, H, W), jnp.float32)

    configs = [
        (16, 3, 1, kw1),   # (out_channels, kernel_size, stride, key)
        (32, 3, 2, kw2),
    ]
    for out_c, ksz, stride, kw in configs:
        params = make_params(kw, Cin, out_c, ksz, stride)
        out = residual_module_forward(x, params)
        out = jax.block_until_ready(out)
        ref = reference_forward(x, params)
        Ho = (H + 2 * ((ksz - 1) // 2) - ksz) // stride + 1
        Wo = (W + 2 * ((ksz - 1) // 2) - ksz) // stride + 1
        assert out.shape == (N, out_c, Ho, Wo), out.shape
        assert bool(jnp.all(jnp.isfinite(out)))
        max_err = float(jnp.max(jnp.abs(out - ref)))
        assert max_err < 5e-3, f"max abs error {max_err}"

    print("KERNEL_OK")
</pallas_src>

<mosaic_0001>
module attributes {stable_mosaic.version = 11 : i64} {
  func.func @_conv_bn_kernel(%arg0: i32, %arg1: memref<256x36xf32, #tpu.memory_space<vmem>>, %arg2: memref<36x16xf32, #tpu.memory_space<vmem>>, %arg3: memref<1x16xf32, #tpu.memory_space<vmem>>, %arg4: memref<1x16xf32, #tpu.memory_space<vmem>>, %arg5: memref<256x16xf32, #tpu.memory_space<vmem>>) attributes {dimension_semantics = [#tpu.dimension_semantics<parallel>], iteration_bounds = array<i64: 2>, scalar_prefetch = 0 : i64, scratch_operands = 0 : i64, tpu.core_type = #tpu.core_type<tc>, window_params = [{transform_indices = @transform_0, window_bounds = array<i64: 256, 36>}, {pipeline_mode = #tpu.pipeline_mode<synchronous>, transform_indices = @transform_1, window_bounds = array<i64: 36, 16>}, {pipeline_mode = #tpu.pipeline_mode<synchronous>, transform_indices = @transform_2, window_bounds = array<i64: 1, 16>}, {pipeline_mode = #tpu.pipeline_mode<synchronous>, transform_indices = @transform_3, window_bounds = array<i64: 1, 16>}, {transform_indices = @transform_4, window_bounds = array<i64: 256, 16>}]} {
    %c0 = arith.constant 0 : index
    %c0_0 = arith.constant 0 : index
    %0 = vector.load %arg1[%c0, %c0_0] : memref<256x36xf32, #tpu.memory_space<vmem>>, vector<256x36xf32>
    %c0_1 = arith.constant 0 : index
    %c0_2 = arith.constant 0 : index
    %1 = vector.load %arg2[%c0_1, %c0_2] : memref<36x16xf32, #tpu.memory_space<vmem>>, vector<36x16xf32>
    %cst = arith.constant dense<0.000000e+00> : vector<256x16xf32>
    %2 = tpu.matmul %0, %1, %cst {dimension_numbers = #tpu.dot_dimension_numbers<[1], [0], [0], [1], [0, 0, 1, 1], [], []>} : vector<256x36xf32>, vector<36x16xf32>, vector<256x16xf32> -> vector<256x16xf32>
    %c0_3 = arith.constant 0 : index
    %c0_4 = arith.constant 0 : index
    %3 = vector.load %arg3[%c0_3, %c0_4] : memref<1x16xf32, #tpu.memory_space<vmem>>, vector<1x16xf32>
    %4 = vector.broadcast %3 : vector<1x16xf32> to vector<256x16xf32>
    %5 = arith.mulf %2, %4 : vector<256x16xf32>
    %c0_5 = arith.constant 0 : index
    %c0_6 = arith.constant 0 : index
    %6 = vector.load %arg4[%c0_5, %c0_6] : memref<1x16xf32, #tpu.memory_space<vmem>>, vector<1x16xf32>
    %7 = vector.broadcast %6 : vector<1x16xf32> to vector<256x16xf32>
    %8 = arith.addf %5, %7 : vector<256x16xf32>
    %c0_7 = arith.constant 0 : index
    %c0_8 = arith.constant 0 : index
    %9 = vector.load %arg5[%c0_7, %c0_8] : memref<256x16xf32, #tpu.memory_space<vmem>>, vector<256x16xf32>
    tpu.vector_store %arg5[%c0_7, %c0_8], %8 {strides = array<i32>} : memref<256x16xf32, #tpu.memory_space<vmem>>, vector<256x16xf32>,
    return
  }
  func.func @transform_0(%arg0: i32) -> (i32, i32) {
    %c0_i32 = arith.constant 0 : i32
    %c0_i32_0 = arith.constant 0 : i32
    return %arg0, %c0_i32 : i32, i32
  }
  func.func @transform_1(%arg0: i32) -> (i32, i32) {
    %c0_i32 = arith.constant 0 : i32
    %c0_i32_0 = arith.constant 0 : i32
    %c0_i32_1 = arith.constant 0 : i32
    return %c0_i32, %c0_i32_0 : i32, i32
  }
  func.func @transform_2(%arg0: i32) -> (i32, i32) {
    %c0_i32 = arith.constant 0 : i32
    %c0_i32_0 = arith.constant 0 : i32
    %c0_i32_1 = arith.constant 0 : i32
    return %c0_i32, %c0_i32_0 : i32, i32
  }
  func.func @transform_3(%arg0: i32) -> (i32, i32) {
    %c0_i32 = arith.constant 0 : i32
    %c0_i32_0 = arith.constant 0 : i32
    %c0_i32_1 = arith.constant 0 : i32
    return %c0_i32, %c0_i32_0 : i32, i32
  }
  func.func @transform_4(%arg0: i32) -> (i32, i32) {
    %c0_i32 = arith.constant 0 : i32
    %c0_i32_0 = arith.constant 0 : i32
    return %arg0, %c0_i32 : i32, i32
  }
}

</mosaic_0001>

<bundles_post_ra>
// kernel: tpu_custom_call.1
= control target key start
LH: loop header
LB: loop body
LE: loop exit
PB: predicated region body
PF: predicated region fallthrough
CT: control target
= control target key end

     0   :  { %s927_s15 = smov 0   ;;  %s1176_s0 = inlined_call_operand.vmem [shape: f32[512,36], index: 0, kind: input, shape index: {}]   ;;  %s1177_s1 = inlined_call_operand.vmem [shape: f32[36,16], index: 1, kind: input, shape index: {}]   ;;  %s1178_s2 = inlined_call_operand.vmem [shape: f32[1,16], index: 2, kind: input, shape index: {}]   ;;  %s1179_s3 = inlined_call_operand.vmem [shape: f32[1,16], index: 3, kind: input, shape index: {}]   ;;  %s1180_s4 = inlined_call_operand.vmem [shape: f32[512,16], index: 4, kind: output, shape index: {}]  }
   0x1 LB: > { %s731_s16 = sadd.s32 4294967295, %s900_s15   ;;  %p735_p0 = scmp.ge.s32.totalorder %s900_s15, 1  ;;  %s900_s15 = sphi %s927_s15, %s14_s15  }
   0x2   : > { %p163_p1 = scmp.lt.s32.totalorder %s900_s15, 3 }
   0x4   : > { %p164_p2 = pnand %p735_p0, %p163_p1 }
   0x5   : > { %v233_v0 = vld [vmem:[%s1177_s1] sm:$0xff] (!%p164_p2)  ;;  %v234_v1 = vld [vmem:[%s1177_s1 + $0x8] sm:$0xff] (!%p164_p2)  ;;  %v235_v2 = vld [vmem:[%s1177_s1 + $0x10] sm:$0xff] (!%p164_p2)  ;;  %s736_s23 = sshll.u32 (!%p164_p2), %s731_s16, 5  ;;  %vm335_vm0 = vcmask (!%p164_p2), 1043456   ;;  %vm238_vm1 = vcmask (!%p164_p2), 293888  }
   0x6   : > { %167 = sbr.rel (%p164_p2) target bundleno = 265 (0x109), region = 36  ;;  %v872_v3 = vpack.c.bf16 (!%p164_p2), %v234_v1, %v233_v0  ;;  %v236_v4 = vld [vmem:[%s1177_s1 + $0x18] sm:$0xff] (!%p164_p2)  ;;  %p190_p3 = scmp.lt.s32.totalorder (!%p164_p2), %s736_s23, 63  ;;  %v237_v6 = vld [vmem:[%s1177_s1 + $0x20] sm:$0xf] (!%p164_p2)  ;;  %vm642_vm2 = vcmask (!%p164_p2), 130048  }
   0x7   : > { %v876_v5 = vpack.c.bf16 (!%p164_p2), %v236_v4, %v235_v2  ;;  %v1031_v39 = vld [vmem:[%s1178_s2] ss:$0 sm:$0xff] (!%p164_p2) }
   0x8   : > { %873 = vmatprep.subr.bf16.mxu0 (!%p164_p2), %v872_v3  ;;  %880 = vmatprep.subr.bf16.mxu1 (!%p164_p2), %v872_v3  ;;  %v1036_v41 = vld [vmem:[%s1179_s3] ss:$0 sm:$0xff] (!%p164_p2) }
   0x9   : > { %875 = vmatpush3.bf16.msra.mxu0 (!%p164_p2), %v872_v3  ;;  %883 = vmatpush3.bf16.msra.mxu1 (!%p164_p2), %v872_v3 }
   0xa   : > { %877 = vmatprep.subr.bf16.mxu0 (!%p164_p2), %v876_v5  ;;  %881 = vmatprep.subr.bf16.mxu1 (!%p164_p2), %v876_v5 }
   0xd   : > { %s1182_s23 = smov (!%p190_p3, %s736_s23), 63  ;;  %879 = vmatpush3.bf16.msra.mxu0 %v876_v5  ;;  %884 = vmatpush3.bf16.msra.mxu1 %v876_v5 }
   0xe   : > { %s737_s26 = sshll.u32 %s1182_s23, 3  ;;  %822 = vmatprep.subr.msk.mxu0 %vm335_vm0, %v237_v6  ;;  %882 = vmatprep.subr.msk.mxu1 %vm335_vm0, %v237_v6 }
   0xf   : > { %s958_s5 = scalar_lea.vmem %s1176_s0, %s737_s26  ;;  %s1045_s12 = scalar_lea.vmem %s1180_s4, %s737_s26 }
  0x10   : > { %v201_v7 = vld [vmem:[%s958_s5] sm:$0xff]  ;;  %v202_v9 = vld [vmem:[%s958_s5 + $0x8] sm:$0xff]  ;;  %v203_v11 = vld [vmem:[%s958_s5 + $0x10] sm:$0xff] }
  0x11   : > { %v217_v8 = vld [vmem:[%s958_s5 + $0x80] sm:$0xff]  ;;  %824 = vmatprep.mubr.msk.f32.mxu0 %vm238_vm1, %v201_v7  ;;  %v218_v10 = vld [vmem:[%s958_s5 + $0x88] sm:$0xff]  ;;  %v219_v12 = vld [vmem:[%s958_s5 + $0x90] sm:$0xff]  ;;  %823 = vmatpush3.msk.msra.mxu0 %vm335_vm0, %v237_v6 }
  0x12   : > { %848 = vmatprep.mubr.msk.f32.mxu1 %vm238_vm1, %v217_v8  ;;  %885 = vmatpush3.msk.msra.mxu1 %vm335_vm0, %v237_v6  ;;  %v204_v13 = vld [vmem:[%s958_s5 + $0x18] sm:$0xff]  ;;  %v205_v15 = vld [vmem:[%s958_s5 + $0x20] sm:$0xff]  ;;  %v206_v17 = vld [vmem:[%s958_s5 + $0x28] sm:$0xff] }
  0x13   : > { %825 = vmatmul.mubr.msk.f32.vlgmr.msra.gmra.mrb[0].mxu0 %vm238_vm1, %v202_v9  ;;  %849 = vmatmul.mubr.msk.f32.vlgmr.msra.gmra.mrb[0].mxu1 %vm238_vm1, %v218_v10  ;;  %v220_v14 = vld [vmem:[%s958_s5 + $0x98] sm:$0xff]  ;;  %v221_v16 = vld [vmem:[%s958_s5 + $0xa0] sm:$0xff]  ;;  %v222_v18 = vld [vmem:[%s958_s5 + $0xa8] sm:$0xff] }
  0x14   : > { %827 = vmatprep.mubr.msk.f32.mxu0 %vm238_vm1, %v203_v11  ;;  %851 = vmatprep.mubr.msk.f32.mxu1 %vm238_vm1, %v219_v12  ;;  %v207_v19 = vld [vmem:[%s958_s5 + $0x30] sm:$0xff]  ;;  %v208_v21 = vld [vmem:[%s958_s5 + $0x38] sm:$0xff]  ;;  %v209_v23 = vld [vmem:[%s958_s5 + $0x40] sm:$0xff] }
  0x15   : > { %v223_v20 = vld [vmem:[%s958_s5 + $0xb0] sm:$0xff]  ;;  %v224_v22 = vld [vmem:[%s958_s5 + $0xb8] sm:$0xff]  ;;  %v225_v24 = vld [vmem:[%s958_s5 + $0xc0] sm:$0xff] }
  0x16   : > { %v210_v25 = vld [vmem:[%s958_s5 + $0x48] sm:$0xff]  ;;  %v211_v27 = vld [vmem:[%s958_s5 + $0x50] sm:$0xff]  ;;  %v212_v29 = vld [vmem:[%s958_s5 + $0x58] sm:$0xff] }
  0x17   : > { %828 = vmatmul.mubr.msk.f32.gmra.mrb[2].mxu0 %vm238_vm1, %v204_v13  ;;  %852 = vmatmul.mubr.msk.f32.gmra.mrb[2].mxu1 %vm238_vm1, %v220_v14  ;;  %v226_v26 = vld [vmem:[%s958_s5 + $0xc8] sm:$0xff]  ;;  %v227_v28 = vld [vmem:[%s958_s5 + $0xd0] sm:$0xff]  ;;  %v228_v30 = vld [vmem:[%s958_s5 + $0xd8] sm:$0xff] }
  0x18   : > { %830 = vmatprep.mubr.msk.f32.mxu0 %vm238_vm1, %v205_v15  ;;  %854 = vmatprep.mubr.msk.f32.mxu1 %vm238_vm1, %v221_v16  ;;  %v213_v31 = vld [vmem:[%s958_s5 + $0x60] sm:$0xff]  ;;  %v214_v33 = vld [vmem:[%s958_s5 + $0x68] sm:$0xff]  ;;  %v215_v35 = vld [vmem:[%s958_s5 + $0x70] sm:$0xff] }
  0x19   : > { %v229_v32 = vld [vmem:[%s958_s5 + $0xe0] sm:$0xff]  ;;  %v230_v34 = vld [vmem:[%s958_s5 + $0xe8] sm:$0xff]  ;;  %v231_v36 = vld [vmem:[%s958_s5 + $0xf0] sm:$0xff] }
  0x1a   : > { %v216_v37 = vld [vmem:[%s958_s5 + $0x78] sm:$0xff] }
  0x1b   : > { %831 = vmatmul.mubr.msk.f32.gmra.mrb[4].mxu0 %vm238_vm1, %v206_v17  ;;  %855 = vmatmul.mubr.msk.f32.gmra.mrb[4].mxu1 %vm238_vm1, %v222_v18  ;;  %v232_v38 = vld [vmem:[%s958_s5 + $0xf8] sm:$0xff] }
  0x1c   : > { %833 = vmatprep.mubr.msk.f32.mxu0 %vm238_vm1, %v207_v19  ;;  %857 = vmatprep.mubr.msk.f32.mxu1 %vm238_vm1, %v223_v20 }
  0x1f   : > { %834 = vmatmul.mubr.msk.f32.gmra.mrb[6].mxu0 %vm238_vm1, %v208_v21  ;;  %858 = vmatmul.mubr.msk.f32.gmra.mrb[6].mxu1 %vm238_vm1, %v224_v22 }
  0x20   : > { %836 = vmatprep.mubr.msk.f32.mxu0 %vm238_vm1, %v209_v23  ;;  %860 = vmatprep.mubr.msk.f32.mxu1 %vm238_vm1, %v225_v24 }
  0x23   : > { %837 = vmatmul.mubr.msk.f32.gmra.mrb[8].mxu0 %vm238_vm1, %v210_v25  ;;  %861 = vmatmul.mubr.msk.f32.gmra.mrb[8].mxu1 %vm238_vm1, %v226_v26 }
  0x24   : > { %839 = vmatprep.mubr.msk.f32.mxu0 %vm238_vm1, %v211_v27  ;;  %863 = vmatprep.mubr.msk.f32.mxu1 %vm238_vm1, %v227_v28 }
  0x27   : > { %840 = vmatmul.mubr.msk.f32.gmra.mrb[10].mxu0 %vm238_vm1, %v212_v29  ;;  %864 = vmatmul.mubr.msk.f32.gmra.mrb[10].mxu1 %vm238_vm1, %v228_v30 }
  0x28   : > { %842 = vmatprep.mubr.msk.f32.mxu0 %vm238_vm1, %v213_v31  ;;  %866 = vmatprep.mubr.msk.f32.mxu1 %vm238_vm1, %v229_v32 }
  0x2b   : > { %843 = vmatmul.mubr.msk.f32.gmra.mrb[12].mxu0 %vm238_vm1, %v214_v33  ;;  %867 = vmatmul.mubr.msk.f32.gmra.mrb[12].mxu1 %vm238_vm1, %v230_v34 }
  0x2c   : > { %845 = vmatprep.mubr.msk.f32.mxu0 %vm238_vm1, %v215_v35  ;;  %869 = vmatprep.mubr.msk.f32.mxu1 %vm238_vm1, %v231_v36 }
  0x2f   : > { %846 = vmatmul.mubr.msk.f32.gmra.mrb[14].mxu0 %vm238_vm1, %v216_v37  ;;  %870 = vmatmul.mubr.msk.f32.gmra.mrb[14].mxu1 %vm238_vm1, %v232_v38 }
  0xe6   : > { %v826_v40 = vpop.f32.mrb[0].mxu0  ;;  %v850_v42 = vpop.f32.mrb[0].mxu1 }
  0xe7   : > { %v572_v43 = vmul.f32 %v826_v40, %v1031_v39  ;;  %v588_v44 = vmul.f32 %v850_v42, %v1031_v39  ;;  %v405_v45 = vpop.f32.mrb[1].mxu0  ;;  %v485_v46 = vpop.f32.mrb[1].mxu1 }
  0xe8   : > { %v571_v47 = vmul.f32 %v1031_v39, %v405_v45  ;;  %v587_v48 = vmul.f32 %v1031_v39, %v485_v46 }
  0xe9   : > { %v611_v49 = vadd.f32 %v1036_v41, %v572_v43  ;;  %v627_v50 = vadd.f32 %v1036_v41, %v588_v44 }
  0xea   : > { %v610_v51 = vadd.f32 %v1036_v41, %v571_v47  ;;  %v626_v52 = vadd.f32 %v1036_v41, %v587_v48  ;;  %v829_v53 = vpop.f32.mrb[2].mxu0  ;;  %v853_v54 = vpop.f32.mrb[2].mxu1 }
  0xeb   : > { %644 = vst.msk [vmem:[%s1045_s12 + $0x8] sm:$0xff] %vm642_vm2, %v611_v49  ;;  %660 = vst.msk [vmem:[%s1045_s12 + $0x88] sm:$0xff] %vm642_vm2, %v627_v50  ;;  %v574_v55 = vmul.f32 %v829_v53, %v1031_v39  ;;  %v590_v56 = vmul.f32 %v853_v54, %v1031_v39  ;;  %v415_v57 = vpop.f32.mrb[3].mxu0  ;;  %v495_v58 = vpop.f32.mrb[3].mxu1 }
  0xec   : > { %643 = vst.msk [vmem:[%s1045_s12] sm:$0xff] %vm642_vm2, %v610_v51  ;;  %659 = vst.msk [vmem:[%s1045_s12 + $0x80] sm:$0xff] %vm642_vm2, %v626_v52  ;;  %v573_v59 = vmul.f32 %v1031_v39, %v415_v57  ;;  %v589_v60 = vmul.f32 %v1031_v39, %v495_v58 }
  0xed   : > { %v613_v61 = vadd.f32 %v1036_v41, %v574_v55  ;;  %v629_v62 = vadd.f32 %v1036_v41, %v590_v56 }
  0xee   : > { %v612_v63 = vadd.f32 %v1036_v41, %v573_v59  ;;  %v628_v0 = vadd.f32 %v1036_v41, %v589_v60  ;;  %v832_v1 = vpop.f32.mrb[4].mxu0  ;;  %v856_v2 = vpop.f32.mrb[4].mxu1 }
  0xef   : > { %646 = vst.msk [vmem:[%s1045_s12 + $0x18] sm:$0xff] %vm642_vm2, %v613_v61  ;;  %662 = vst.msk [vmem:[%s1045_s12 + $0x98] sm:$0xff] %vm642_vm2, %v629_v62  ;;  %v576_v3 = vmul.f32 %v832_v1, %v1031_v39  ;;  %v592_v4 = vmul.f32 %v856_v2, %v1031_v39  ;;  %v425_v5 = vpop.f32.mrb[5].mxu0  ;;  %v505_v6 = vpop.f32.mrb[5].mxu1 }
  0xf0   : > { %645 = vst.msk [vmem:[%s1045_s12 + $0x10] sm:$0xff] %vm642_vm2, %v612_v63  ;;  %661 = vst.msk [vmem:[%s1045_s12 + $0x90] sm:$0xff] %vm642_vm2, %v628_v0  ;;  %v575_v7 = vmul.f32 %v1031_v39, %v425_v5  ;;  %v591_v8 = vmul.f32 %v1031_v39, %v505_v6 }
  0xf1   : > { %v615_v9 = vadd.f32 %v1036_v41, %v576_v3  ;;  %v631_v10 = vadd.f32 %v1036_v41, %v592_v4 }
  0xf2   : > { %v614_v11 = vadd.f32 %v1036_v41, %v575_v7  ;;  %v630_v12 = vadd.f32 %v1036_v41, %v591_v8  ;;  %v835_v13 = vpop.f32.mrb[6].mxu0  ;;  %v859_v14 = vpop.f32.mrb[6].mxu1 }
  0xf3   : > { %648 = vst.msk [vmem:[%s1045_s12 + $0x28] sm:$0xff] %vm642_vm2, %v615_v9  ;;  %664 = vst.msk [vmem:[%s1045_s12 + $0xa8] sm:$0xff] %vm642_vm2, %v631_v10  ;;  %v578_v15 = vmul.f32 %v835_v13, %v1031_v39  ;;  %v594_v16 = vmul.f32 %v859_v14, %v1031_v39  ;;  %v435_v17 = vpop.f32.mrb[7].mxu0  ;;  %v515_v18 = vpop.f32.mrb[7].mxu1 }
  0xf4   : > { %647 = vst.msk [vmem:[%s1045_s12 + $0x20] sm:$0xff] %vm642_vm2, %v614_v11  ;;  %663 = vst.msk [vmem:[%s1045_s12 + $0xa0] sm:$0xff] %vm642_vm2, %v630_v12  ;;  %v577_v19 = vmul.f32 %v1031_v39, %v435_v17  ;;  %v593_v20 = vmul.f32 %v1031_v39, %v515_v18 }
  0xf5   : > { %v617_v21 = vadd.f32 %v1036_v41, %v578_v15  ;;  %v633_v22 = vadd.f32 %v1036_v41, %v594_v16 }
  0xf6   : > { %v616_v23 = vadd.f32 %v1036_v41, %v577_v19  ;;  %v632_v24 = vadd.f32 %v1036_v41, %v593_v20  ;;  %v838_v25 = vpop.f32.mrb[8].mxu0  ;;  %v862_v26 = vpop.f32.mrb[8].mxu1 }
  0xf7   : > { %650 = vst.msk [vmem:[%s1045_s12 + $0x38] sm:$0xff] %vm642_vm2, %v617_v21  ;;  %666 = vst.msk [vmem:[%s1045_s12 + $0xb8] sm:$0xff] %vm642_vm2, %v633_v22  ;;  %v580_v27 = vmul.f32 %v838_v25, %v1031_v39  ;;  %v596_v28 = vmul.f32 %v862_v26, %v1031_v39  ;;  %v445_v29 = vpop.f32.mrb[9].mxu0  ;;  %v525_v30 = vpop.f32.mrb[9].mxu1 }
  0xf8   : > { %649 = vst.msk [vmem:[%s1045_s12 + $0x30] sm:$0xff] %vm642_vm2, %v616_v23  ;;  %665 = vst.msk [vmem:[%s1045_s12 + $0xb0] sm:$0xff] %vm642_vm2, %v632_v24  ;;  %v579_v31 = vmul.f32 %v1031_v39, %v445_v29  ;;  %v595_v32 = vmul.f32 %v1031_v39, %v525_v30 }
  0xf9   : > { %v619_v33 = vadd.f32 %v1036_v41, %v580_v27  ;;  %v635_v34 = vadd.f32 %v1036_v41, %v596_v28 }
  0xfa   : > { %v618_v35 = vadd.f32 %v1036_v41, %v579_v31  ;;  %v634_v36 = vadd.f32 %v1036_v41, %v595_v32  ;;  %v841_v37 = vpop.f32.mrb[10].mxu0  ;;  %v865_v38 = vpop.f32.mrb[10].mxu1 }
  0xfb   : > { %652 = vst.msk [vmem:[%s1045_s12 + $0x48] sm:$0xff] %vm642_vm2, %v619_v33  ;;  %668 = vst.msk [vmem:[%s1045_s12 + $0xc8] sm:$0xff] %vm642_vm2, %v635_v34  ;;  %v582_v40 = vmul.f32 %v841_v37, %v1031_v39  ;;  %v598_v42 = vmul.f32 %v865_v38, %v1031_v39  ;;  %v455_v43 = vpop.f32.mrb[11].mxu0  ;;  %v535_v44 = vpop.f32.mrb[11].mxu1 }
  0xfc   : > { %651 = vst.msk [vmem:[%s1045_s12 + $0x40] sm:$0xff] %vm642_vm2, %v618_v35  ;;  %667 = vst.msk [vmem:[%s1045_s12 + $0xc0] sm:$0xff] %vm642_vm2, %v634_v36  ;;  %v581_v45 = vmul.f32 %v1031_v39, %v455_v43  ;;  %v597_v46 = vmul.f32 %v1031_v39, %v535_v44 }
  0xfd   : > { %v621_v47 = vadd.f32 %v1036_v41, %v582_v40  ;;  %v637_v48 = vadd.f32 %v1036_v41, %v598_v42 }
  0xfe   : > { %v620_v49 = vadd.f32 %v1036_v41, %v581_v45  ;;  %v636_v50 = vadd.f32 %v1036_v41, %v597_v46  ;;  %v844_v51 = vpop.f32.mrb[12].mxu0  ;;  %v868_v52 = vpop.f32.mrb[12].mxu1 }
  0xff   : > { %654 = vst.msk [vmem:[%s1045_s12 + $0x58] sm:$0xff] %vm642_vm2, %v621_v47  ;;  %670 = vst.msk [vmem:[%s1045_s12 + $0xd8] sm:$0xff] %vm642_vm2, %v637_v48  ;;  %v584_v53 = vmul.f32 %v844_v51, %v1031_v39  ;;  %v600_v54 = vmul.f32 %v868_v52, %v1031_v39  ;;  %v465_v55 = vpop.f32.mrb[13].mxu0  ;;  %v545_v56 = vpop.f32.mrb[13].mxu1 }
 0x100   : > { %653 = vst.msk [vmem:[%s1045_s12 + $0x50] sm:$0xff] %vm642_vm2, %v620_v49  ;;  %669 = vst.msk [vmem:[%s1045_s12 + $0xd0] sm:$0xff] %vm642_vm2, %v636_v50  ;;  %v583_v57 = vmul.f32 %v1031_v39, %v465_v55  ;;  %v599_v58 = vmul.f32 %v1031_v39, %v545_v56 }
 0x101   : > { %v623_v59 = vadd.f32 %v1036_v41, %v584_v53  ;;  %v639_v60 = vadd.f32 %v1036_v41, %v600_v54 }
 0x102   : > { %v622_v61 = vadd.f32 %v1036_v41, %v583_v57  ;;  %v638_v62 = vadd.f32 %v1036_v41, %v599_v58  ;;  %v847_v63 = vpop.f32.mrb[14].mxu0  ;;  %v871_v0 = vpop.f32.mrb[14].mxu1 }
 0x103   : > { %656 = vst.msk [vmem:[%s1045_s12 + $0x68] sm:$0xff] %vm642_vm2, %v623_v59  ;;  %672 = vst.msk [vmem:[%s1045_s12 + $0xe8] sm:$0xff] %vm642_vm2, %v639_v60  ;;  %v586_v1 = vmul.f32 %v847_v63, %v1031_v39  ;;  %v602_v2 = vmul.f32 %v871_v0, %v1031_v39  ;;  %v475_v3 = vpop.f32.mrb[15].mxu0  ;;  %v555_v4 = vpop.f32.mrb[15].mxu1 }
 0x104   : > { %655 = vst.msk [vmem:[%s1045_s12 + $0x60] sm:$0xff] %vm642_vm2, %v622_v61  ;;  %671 = vst.msk [vmem:[%s1045_s12 + $0xe0] sm:$0xff] %vm642_vm2, %v638_v62  ;;  %v585_v5 = vmul.f32 %v1031_v39, %v475_v3  ;;  %v601_v6 = vmul.f32 %v1031_v39, %v555_v4 }
 0x105   : > { %v625_v7 = vadd.f32 %v1036_v41, %v586_v1  ;;  %v641_v8 = vadd.f32 %v1036_v41, %v602_v2 }
 0x106   : > { %v624_v9 = vadd.f32 %v1036_v41, %v585_v5  ;;  %v640_v10 = vadd.f32 %v1036_v41, %v601_v6 }
 0x107   : > { %658 = vst.msk [vmem:[%s1045_s12 + $0x78] sm:$0xff] %vm642_vm2, %v625_v7  ;;  %674 = vst.msk [vmem:[%s1045_s12 + $0xf8] sm:$0xff] %vm642_vm2, %v641_v8 }
 0x108   : > { %657 = vst.msk [vmem:[%s1045_s12 + $0x70] sm:$0xff] %vm642_vm2, %v624_v9  ;;  %673 = vst.msk [vmem:[%s1045_s12 + $0xf0] sm:$0xff] %vm642_vm2, %v640_v10 }
 0x109 PF: > { %s14_s15 = sadd.s32 1, %s900_s15  }
 0x10a   : > { %p11_p4 = scmp.ge.s32.totalorder %s14_s15, 4  }
 0x10c   :  { %13 = sbr.rel (!%p11_p4) target bundleno = 1 (0x1), region = 66 }

</bundles_post_ra>
